<compile_context>
chip_gen: v7x
topology: tpu7x:2x2x1
jax: 0.10.0
libtpu: 0.0.40
codegen_flags: <defaults>
</compile_context>

<pallas_src>
import jax
import jax.numpy as jnp
import numpy as np
from jax import lax
from jax.experimental import pallas as pl
from jax.experimental.pallas import tpu as pltpu

GATE_PAD = 128  # one full lane group per gate


def icnet_kernel(x_ref, wih_ref, whh_ref, pack_ref, out_ref, gi_ref, traj_ref):
    """GRU recurrence (single batch column) + final Linear, fused.

    x_ref    : (T, D+1)    inputs of GRU-batch column L-1, ones column appended
    wih_ref  : (D+1, 3*GP) fused input->hidden weights [r|z|n], each gate
                           zero-padded to GP lanes; last row = input biases
                           (b_ih_r+b_hh_r | b_ih_z+b_hh_z | b_ih_n)
    whh_ref  : (GP, 3*GP)  fused hidden->hidden weights, rows+lanes zero-padded
    pack_ref : (GP+2, GP)  rows [0:GP] = w_out (padded), row GP = b_hh_n,
                           row GP+1 = b_out
    out_ref  : (T, GP)     lane-dense padded output (sliced to O outside)
    gi_ref   : (T, 3*GP)   VMEM scratch: hoisted fused input projections
    traj_ref : (T, GP)     VMEM scratch: hidden-state trajectory
    """
    T = x_ref.shape[0]
    GP = traj_ref.shape[1]

    # --- hoisted fused input projection (ones column folds the biases);
    #     one small matmul, entirely off the serial h->h chain.
    gi_ref[...] = jnp.dot(x_ref[...], wih_ref[...],
                          preferred_element_type=jnp.float32)

    whh = whh_ref[...]                       # (GP, 3*GP)
    b_hn = pack_ref[GP:GP + 1, :]            # (1, GP)  b_hh_n (stays in r*(.))

    def step(t, h):
        # one fused MXU round trip per step
        gh = jnp.dot(h, whh, preferred_element_type=jnp.float32)   # (1, 3*GP)
        gi_t = gi_ref[pl.ds(t, 1), :]                              # (1, 3*GP)
        # one sigmoid over the fused [r|z] slab, then tanh — 2 EUP pushes/step
        rz = jax.nn.sigmoid(gi_t[:, :2 * GP] + gh[:, :2 * GP])
        r = rz[:, :GP]
        z = rz[:, GP:2 * GP]
        n = jnp.tanh(gi_t[:, 2 * GP:] + r * (gh[:, 2 * GP:] + b_hn))
        h_new = (1.0 - z) * n + z * h
        # trajectory store is off the critical path (hides under MXU latency)
        traj_ref[pl.ds(t, 1), :] = h_new
        return h_new

    h0 = jnp.zeros((1, GP), dtype=jnp.float32)
    if T <= 16:
        # small T: full unroll for LLO scheduling visibility
        h = h0
        for t in range(T):
            h = step(t, h)
    else:
        # large T: bounded unroll keeps vreg pressure / compile time sane
        lax.fori_loop(0, T, step, h0, unroll=8)

    # --- final Linear on the whole trajectory, lane-dense padded output.
    wout = pack_ref[:GP, :]                  # (GP, GP)
    bout = pack_ref[GP + 1:GP + 2, :]        # (1, GP)
    out_ref[...] = (jnp.dot(traj_ref[...], wout,
                            preferred_element_type=jnp.float32) + bout)


def icnet_forward(data, w_ih, w_hh, b_ih, b_hh, w_out, b_out):
    """data: (B, L, D) exactly as ICNet.forward receives it.

    w_ih: (D, 3H), w_hh: (H, 3H), b_ih/b_hh: (1, 3H)  (gate order [r, z, n],
    already transposed vs. PyTorch's (3H, D)/(3H, H) layout).
    w_out: (H, O), b_out: (1, O).
    """
    B, L, D = data.shape
    H = w_hh.shape[0]
    O = w_out.shape[1]
    GP = GATE_PAD
    assert H <= GP and O <= GP, "this layout assumes hidden/output dims <= 128"
    T = B

    # Only GRU-batch column L-1 contributes to rnn_out[:, -1, :].
    x_last = data[:, L - 1, :].astype(jnp.float32)                 # (T, D)
    # Ones column folds the input-side biases into the input matmul.
    x_aug = jnp.concatenate(
        [x_last, jnp.ones((T, 1), dtype=jnp.float32)], axis=1)     # (T, D+1)

    def pad_lanes(a, width):
        return jnp.pad(a, ((0, 0), (0, width - a.shape[1])))

    def fuse_gates(w):  # (K, 3H) -> (K, 3*GP), gate order [r, z, n]
        return jnp.concatenate(
            [pad_lanes(w[:, g * H:(g + 1) * H], GP) for g in range(3)], axis=1)

    # Fused input-bias row: b_ih+b_hh folded for r/z; b_ih_n alone for n
    # (b_hh_n must stay inside r * (W_hn h + b_hn)).
    b_in_row = jnp.concatenate([
        pad_lanes(b_ih[:, :H] + b_hh[:, :H], GP),
        pad_lanes(b_ih[:, H:2 * H] + b_hh[:, H:2 * H], GP),
        pad_lanes(b_ih[:, 2 * H:], GP)], axis=1)                    # (1, 3*GP)

    wih_aug = jnp.concatenate([fuse_gates(w_ih), b_in_row], axis=0)  # (D+1,3GP)

    whh_pad = jnp.pad(fuse_gates(w_hh), ((0, GP - H), (0, 0)))       # (GP, 3GP)

    # misc pack: [w_out (padded) ; b_hh_n ; b_out]
    wout_pad = jnp.pad(w_out, ((0, GP - H), (0, GP - O)))            # (GP, GP)
    b_hn_pad = pad_lanes(b_hh[:, 2 * H:], GP)                        # (1, GP)
    bout_pad = pad_lanes(b_out, GP)                                  # (1, GP)
    pack = jnp.concatenate([wout_pad, b_hn_pad, bout_pad], axis=0)   # (GP+2,GP)

    out_pad = pl.pallas_call(
        icnet_kernel,
        out_shape=jax.ShapeDtypeStruct((T, GP), jnp.float32),
        in_specs=[pl.BlockSpec(memory_space=pltpu.MemorySpace.VMEM)] * 4,
        out_specs=pl.BlockSpec(memory_space=pltpu.MemorySpace.VMEM),
        scratch_shapes=[pltpu.VMEM((T, 3 * GP), jnp.float32),   # gi
                        pltpu.VMEM((T, GP), jnp.float32)],      # trajectory
    )(x_aug, wih_aug, whh_pad, pack)

    return out_pad[:, :O]


def icnet_reference(data, w_ih, w_hh, b_ih, b_hh, w_out, b_out):
    """Pure-JAX reference mirroring nn.GRU (batch_first=False) + Linear,
    running the FULL (all-columns) GRU to validate the column-L-1 shortcut."""
    T, N, D = data.shape
    H = w_hh.shape[0]

    def step(h, x_t):
        gi = x_t @ w_ih + b_ih
        gh = h @ w_hh + b_hh
        r = jax.nn.sigmoid(gi[:, :H] + gh[:, :H])
        z = jax.nn.sigmoid(gi[:, H:2 * H] + gh[:, H:2 * H])
        n = jnp.tanh(gi[:, 2 * H:] + r * gh[:, 2 * H:])
        h_new = (1.0 - z) * n + z * h
        return h_new, h_new

    h0 = jnp.zeros((N, H), jnp.float32)
    _, hs = lax.scan(step, h0, data)          # (T, N, H)
    last = hs[:, -1, :]                       # == rnn_out[:, -1, :]
    return last @ w_out + b_out


if __name__ == "__main__":
    # Small shapes consistent with ICNet: data is B x L_b x 2.
    B, L = 4, 6
    INPUT_DIM, HIDDEN_DIM, OUTPUT_DIM = 2, 32, 8

    key = jax.random.PRNGKey(0)
    k_data, k_wih, k_whh, k_bih, k_bhh, k_wout = jax.random.split(key, 6)

    data = jax.random.normal(k_data, (B, L, INPUT_DIM), dtype=jnp.float32)

    # GRU params: PyTorch init is U(-1/sqrt(H), 1/sqrt(H)); gate order [r,z,n].
    bound = 1.0 / np.sqrt(HIDDEN_DIM)
    w_ih = jax.random.uniform(k_wih, (INPUT_DIM, 3 * HIDDEN_DIM),
                              minval=-bound, maxval=bound, dtype=jnp.float32)
    w_hh = jax.random.uniform(k_whh, (HIDDEN_DIM, 3 * HIDDEN_DIM),
                              minval=-bound, maxval=bound, dtype=jnp.float32)
    b_ih = jax.random.uniform(k_bih, (1, 3 * HIDDEN_DIM),
                              minval=-bound, maxval=bound, dtype=jnp.float32)
    b_hh = jax.random.uniform(k_bhh, (1, 3 * HIDDEN_DIM),
                              minval=-bound, maxval=bound, dtype=jnp.float32)

    # Linear params: utils.init_network_weights(std=0.001) -> N(0, 0.001), bias=0.
    w_out = 0.001 * jax.random.normal(k_wout, (HIDDEN_DIM, OUTPUT_DIM),
                                      dtype=jnp.float32)
    b_out = jnp.zeros((1, OUTPUT_DIM), dtype=jnp.float32)

    out = icnet_forward(data, w_ih, w_hh, b_ih, b_hh, w_out, b_out)
    out = jax.block_until_ready(out)

    ref = icnet_reference(data, w_ih, w_hh, b_ih, b_hh, w_out, b_out)
    ref = jax.block_until_ready(ref)

    assert out.shape == (B, OUTPUT_DIM), out.shape
    np.testing.assert_allclose(np.asarray(out), np.asarray(ref),
                               rtol=1e-4, atol=1e-5)
    print("KERNEL_OK")
</pallas_src>

<mosaic_0001>
module attributes {stable_mosaic.version = 11 : i64} {
  func.func @icnet_kernel(%arg0: memref<4x3xf32, #tpu.memory_space<vmem>>, %arg1: memref<3x384xf32, #tpu.memory_space<vmem>>, %arg2: memref<128x384xf32, #tpu.memory_space<vmem>>, %arg3: memref<130x128xf32, #tpu.memory_space<vmem>>, %arg4: memref<4x128xf32, #tpu.memory_space<vmem>>, %arg5: memref<4x384xf32, #tpu.memory_space<vmem>>, %arg6: memref<4x128xf32, #tpu.memory_space<vmem>>) attributes {dimension_semantics = [], scalar_prefetch = 0 : i64, scratch_operands = 2 : i64, tpu.core_type = #tpu.core_type<tc>} {
    %c0 = arith.constant 0 : index
    %c0_0 = arith.constant 0 : index
    %0 = vector.load %arg0[%c0, %c0_0] : memref<4x3xf32, #tpu.memory_space<vmem>>, vector<4x3xf32>
    %c0_1 = arith.constant 0 : index
    %c0_2 = arith.constant 0 : index
    %1 = vector.load %arg1[%c0_1, %c0_2] : memref<3x384xf32, #tpu.memory_space<vmem>>, vector<3x384xf32>
    %cst = arith.constant dense<0.000000e+00> : vector<4x384xf32>
    %2 = tpu.matmul %0, %1, %cst {dimension_numbers = #tpu.dot_dimension_numbers<[1], [0], [0], [1], [0, 0, 1, 1], [], []>} : vector<4x3xf32>, vector<3x384xf32>, vector<4x384xf32> -> vector<4x384xf32>
    %c0_3 = arith.constant 0 : index
    %c0_4 = arith.constant 0 : index
    %3 = vector.load %arg5[%c0_3, %c0_4] : memref<4x384xf32, #tpu.memory_space<vmem>>, vector<4x384xf32>
    tpu.vector_store %arg5[%c0_3, %c0_4], %2 {strides = array<i32>} : memref<4x384xf32, #tpu.memory_space<vmem>>, vector<4x384xf32>,
    %c0_5 = arith.constant 0 : index
    %c0_6 = arith.constant 0 : index
    %4 = vector.load %arg2[%c0_5, %c0_6] : memref<128x384xf32, #tpu.memory_space<vmem>>, vector<128x384xf32>
    %c128 = arith.constant 128 : index
    %c0_7 = arith.constant 0 : index
    %5 = vector.load %arg3[%c128, %c0_7] : memref<130x128xf32, #tpu.memory_space<vmem>>, vector<1x128xf32>
    %cst_8 = arith.constant 0.000000e+00 : f32
    %6 = vector.broadcast %cst_8 : f32 to vector<1x128xf32>
    %cst_9 = arith.constant dense<0.000000e+00> : vector<1x384xf32>
    %7 = tpu.matmul %6, %4, %cst_9 {dimension_numbers = #tpu.dot_dimension_numbers<[1], [0], [0], [1], [0, 0, 1, 1], [], []>} : vector<1x128xf32>, vector<128x384xf32>, vector<1x384xf32> -> vector<1x384xf32>
    %c0_10 = arith.constant 0 : index
    %c0_11 = arith.constant 0 : index
    %8 = vector.load %arg5[%c0_10, %c0_11] : memref<4x384xf32, #tpu.memory_space<vmem>>, vector<1x384xf32>
    %9 = vector.extract_strided_slice %8 {offsets = [0, 0], sizes = [1, 256], strides = [1, 1]} : vector<1x384xf32> to vector<1x256xf32>
    %10 = vector.extract_strided_slice %7 {offsets = [0, 0], sizes = [1, 256], strides = [1, 1]} : vector<1x384xf32> to vector<1x256xf32>
    %11 = arith.addf %9, %10 : vector<1x256xf32>
    %12 = arith.negf %11 : vector<1x256xf32>
    %13 = math.exp %12 : vector<1x256xf32>
    %cst_12 = arith.constant 1.000000e+00 : f32
    %14 = vector.broadcast %cst_12 : f32 to vector<1x256xf32>
    %15 = arith.addf %14, %13 : vector<1x256xf32>
    %16 = arith.divf %14, %15 : vector<1x256xf32>
    %17 = vector.extract_strided_slice %16 {offsets = [0, 0], sizes = [1, 128], strides = [1, 1]} : vector<1x256xf32> to vector<1x128xf32>
    %18 = vector.extract_strided_slice %16 {offsets = [0, 128], sizes = [1, 128], strides = [1, 1]} : vector<1x256xf32> to vector<1x128xf32>
    %19 = vector.extract_strided_slice %8 {offsets = [0, 256], sizes = [1, 128], strides = [1, 1]} : vector<1x384xf32> to vector<1x128xf32>
    %20 = vector.extract_strided_slice %7 {offsets = [0, 256], sizes = [1, 128], strides = [1, 1]} : vector<1x384xf32> to vector<1x128xf32>
    %21 = arith.addf %20, %5 : vector<1x128xf32>
    %22 = arith.mulf %17, %21 : vector<1x128xf32>
    %23 = arith.addf %19, %22 : vector<1x128xf32>
    %24 = math.tanh %23 : vector<1x128xf32>
    %cst_13 = arith.constant 1.000000e+00 : f32
    %25 = vector.broadcast %cst_13 : f32 to vector<1x128xf32>
    %26 = arith.subf %25, %18 : vector<1x128xf32>
    %27 = arith.mulf %26, %24 : vector<1x128xf32>
    %28 = arith.mulf %18, %6 : vector<1x128xf32>
    %29 = arith.addf %27, %28 : vector<1x128xf32>
    %c0_14 = arith.constant 0 : index
    %c0_15 = arith.constant 0 : index
    %30 = vector.load %arg6[%c0_14, %c0_15] : memref<4x128xf32, #tpu.memory_space<vmem>>, vector<1x128xf32>
    tpu.vector_store %arg6[%c0_14, %c0_15], %29 {strides = array<i32>} : memref<4x128xf32, #tpu.memory_space<vmem>>, vector<1x128xf32>,
    %cst_16 = arith.constant dense<0.000000e+00> : vector<1x384xf32>
    %31 = tpu.matmul %29, %4, %cst_16 {dimension_numbers = #tpu.dot_dimension_numbers<[1], [0], [0], [1], [0, 0, 1, 1], [], []>} : vector<1x128xf32>, vector<128x384xf32>, vector<1x384xf32> -> vector<1x384xf32>
    %c1 = arith.constant 1 : index
    %c0_17 = arith.constant 0 : index
    %32 = vector.load %arg5[%c1, %c0_17] : memref<4x384xf32, #tpu.memory_space<vmem>>, vector<1x384xf32>
    %33 = vector.extract_strided_slice %32 {offsets = [0, 0], sizes = [1, 256], strides = [1, 1]} : vector<1x384xf32> to vector<1x256xf32>
    %34 = vector.extract_strided_slice %31 {offsets = [0, 0], sizes = [1, 256], strides = [1, 1]} : vector<1x384xf32> to vector<1x256xf32>
    %35 = arith.addf %33, %34 : vector<1x256xf32>
    %36 = arith.negf %35 : vector<1x256xf32>
    %37 = math.exp %36 : vector<1x256xf32>
    %cst_18 = arith.constant 1.000000e+00 : f32
    %38 = vector.broadcast %cst_18 : f32 to vector<1x256xf32>
    %39 = arith.addf %38, %37 : vector<1x256xf32>
    %40 = arith.divf %38, %39 : vector<1x256xf32>
    %41 = vector.extract_strided_slice %40 {offsets = [0, 0], sizes = [1, 128], strides = [1, 1]} : vector<1x256xf32> to vector<1x128xf32>
    %42 = vector.extract_strided_slice %40 {offsets = [0, 128], sizes = [1, 128], strides = [1, 1]} : vector<1x256xf32> to vector<1x128xf32>
    %43 = vector.extract_strided_slice %32 {offsets = [0, 256], sizes = [1, 128], strides = [1, 1]} : vector<1x384xf32> to vector<1x128xf32>
    %44 = vector.extract_strided_slice %31 {offsets = [0, 256], sizes = [1, 128], strides = [1, 1]} : vector<1x384xf32> to vector<1x128xf32>
    %45 = arith.addf %44, %5 : vector<1x128xf32>
    %46 = arith.mulf %41, %45 : vector<1x128xf32>
    %47 = arith.addf %43, %46 : vector<1x128xf32>
    %48 = math.tanh %47 : vector<1x128xf32>
    %cst_19 = arith.constant 1.000000e+00 : f32
    %49 = vector.broadcast %cst_19 : f32 to vector<1x128xf32>
    %50 = arith.subf %49, %42 : vector<1x128xf32>
    %51 = arith.mulf %50, %48 : vector<1x128xf32>
    %52 = arith.mulf %42, %29 : vector<1x128xf32>
    %53 = arith.addf %51, %52 : vector<1x128xf32>
    %c1_20 = arith.constant 1 : index
    %c0_21 = arith.constant 0 : index
    %54 = vector.load %arg6[%c1_20, %c0_21] : memref<4x128xf32, #tpu.memory_space<vmem>>, vector<1x128xf32>
    tpu.vector_store %arg6[%c1_20, %c0_21], %53 {strides = array<i32>} : memref<4x128xf32, #tpu.memory_space<vmem>>, vector<1x128xf32>,
    %cst_22 = arith.constant dense<0.000000e+00> : vector<1x384xf32>
    %55 = tpu.matmul %53, %4, %cst_22 {dimension_numbers = #tpu.dot_dimension_numbers<[1], [0], [0], [1], [0, 0, 1, 1], [], []>} : vector<1x128xf32>, vector<128x384xf32>, vector<1x384xf32> -> vector<1x384xf32>
    %c2 = arith.constant 2 : index
    %c0_23 = arith.constant 0 : index
    %56 = vector.load %arg5[%c2, %c0_23] : memref<4x384xf32, #tpu.memory_space<vmem>>, vector<1x384xf32>
    %57 = vector.extract_strided_slice %56 {offsets = [0, 0], sizes = [1, 256], strides = [1, 1]} : vector<1x384xf32> to vector<1x256xf32>
    %58 = vector.extract_strided_slice %55 {offsets = [0, 0], sizes = [1, 256], strides = [1, 1]} : vector<1x384xf32> to vector<1x256xf32>
    %59 = arith.addf %57, %58 : vector<1x256xf32>
    %60 = arith.negf %59 : vector<1x256xf32>
    %61 = math.exp %60 : vector<1x256xf32>
    %cst_24 = arith.constant 1.000000e+00 : f32
    %62 = vector.broadcast %cst_24 : f32 to vector<1x256xf32>
    %63 = arith.addf %62, %61 : vector<1x256xf32>
    %64 = arith.divf %62, %63 : vector<1x256xf32>
    %65 = vector.extract_strided_slice %64 {offsets = [0, 0], sizes = [1, 128], strides = [1, 1]} : vector<1x256xf32> to vector<1x128xf32>
    %66 = vector.extract_strided_slice %64 {offsets = [0, 128], sizes = [1, 128], strides = [1, 1]} : vector<1x256xf32> to vector<1x128xf32>
    %67 = vector.extract_strided_slice %56 {offsets = [0, 256], sizes = [1, 128], strides = [1, 1]} : vector<1x384xf32> to vector<1x128xf32>
    %68 = vector.extract_strided_slice %55 {offsets = [0, 256], sizes = [1, 128], strides = [1, 1]} : vector<1x384xf32> to vector<1x128xf32>
    %69 = arith.addf %68, %5 : vector<1x128xf32>
    %70 = arith.mulf %65, %69 : vector<1x128xf32>
    %71 = arith.addf %67, %70 : vector<1x128xf32>
    %72 = math.tanh %71 : vector<1x128xf32>
    %cst_25 = arith.constant 1.000000e+00 : f32
    %73 = vector.broadcast %cst_25 : f32 to vector<1x128xf32>
    %74 = arith.subf %73, %66 : vector<1x128xf32>
    %75 = arith.mulf %74, %72 : vector<1x128xf32>
    %76 = arith.mulf %66, %53 : vector<1x128xf32>
    %77 = arith.addf %75, %76 : vector<1x128xf32>
    %c2_26 = arith.constant 2 : index
    %c0_27 = arith.constant 0 : index
    %78 = vector.load %arg6[%c2_26, %c0_27] : memref<4x128xf32, #tpu.memory_space<vmem>>, vector<1x128xf32>
    tpu.vector_store %arg6[%c2_26, %c0_27], %77 {strides = array<i32>} : memref<4x128xf32, #tpu.memory_space<vmem>>, vector<1x128xf32>,
    %cst_28 = arith.constant dense<0.000000e+00> : vector<1x384xf32>
    %79 = tpu.matmul %77, %4, %cst_28 {dimension_numbers = #tpu.dot_dimension_numbers<[1], [0], [0], [1], [0, 0, 1, 1], [], []>} : vector<1x128xf32>, vector<128x384xf32>, vector<1x384xf32> -> vector<1x384xf32>
    %c3 = arith.constant 3 : index
    %c0_29 = arith.constant 0 : index
    %80 = vector.load %arg5[%c3, %c0_29] : memref<4x384xf32, #tpu.memory_space<vmem>>, vector<1x384xf32>
    %81 = vector.extract_strided_slice %80 {offsets = [0, 0], sizes = [1, 256], strides = [1, 1]} : vector<1x384xf32> to vector<1x256xf32>
    %82 = vector.extract_strided_slice %79 {offsets = [0, 0], sizes = [1, 256], strides = [1, 1]} : vector<1x384xf32> to vector<1x256xf32>
    %83 = arith.addf %81, %82 : vector<1x256xf32>
    %84 = arith.negf %83 : vector<1x256xf32>
    %85 = math.exp %84 : vector<1x256xf32>
    %cst_30 = arith.constant 1.000000e+00 : f32
    %86 = vector.broadcast %cst_30 : f32 to vector<1x256xf32>
    %87 = arith.addf %86, %85 : vector<1x256xf32>
    %88 = arith.divf %86, %87 : vector<1x256xf32>
    %89 = vector.extract_strided_slice %88 {offsets = [0, 0], sizes = [1, 128], strides = [1, 1]} : vector<1x256xf32> to vector<1x128xf32>
    %90 = vector.extract_strided_slice %88 {offsets = [0, 128], sizes = [1, 128], strides = [1, 1]} : vector<1x256xf32> to vector<1x128xf32>
    %91 = vector.extract_strided_slice %80 {offsets = [0, 256], sizes = [1, 128], strides = [1, 1]} : vector<1x384xf32> to vector<1x128xf32>
    %92 = vector.extract_strided_slice %79 {offsets = [0, 256], sizes = [1, 128], strides = [1, 1]} : vector<1x384xf32> to vector<1x128xf32>
    %93 = arith.addf %92, %5 : vector<1x128xf32>
    %94 = arith.mulf %89, %93 : vector<1x128xf32>
    %95 = arith.addf %91, %94 : vector<1x128xf32>
    %96 = math.tanh %95 : vector<1x128xf32>
    %cst_31 = arith.constant 1.000000e+00 : f32
    %97 = vector.broadcast %cst_31 : f32 to vector<1x128xf32>
    %98 = arith.subf %97, %90 : vector<1x128xf32>
    %99 = arith.mulf %98, %96 : vector<1x128xf32>
    %100 = arith.mulf %90, %77 : vector<1x128xf32>
    %101 = arith.addf %99, %100 : vector<1x128xf32>
    %c3_32 = arith.constant 3 : index
    %c0_33 = arith.constant 0 : index
    %102 = vector.load %arg6[%c3_32, %c0_33] : memref<4x128xf32, #tpu.memory_space<vmem>>, vector<1x128xf32>
    tpu.vector_store %arg6[%c3_32, %c0_33], %101 {strides = array<i32>} : memref<4x128xf32, #tpu.memory_space<vmem>>, vector<1x128xf32>,
    %c0_34 = arith.constant 0 : index
    %c0_35 = arith.constant 0 : index
    %103 = vector.load %arg3[%c0_34, %c0_35] : memref<130x128xf32, #tpu.memory_space<vmem>>, vector<128x128xf32>
    %c129 = arith.constant 129 : index
    %c0_36 = arith.constant 0 : index
    %104 = vector.load %arg3[%c129, %c0_36] : memref<130x128xf32, #tpu.memory_space<vmem>>, vector<1x128xf32>
    %c0_37 = arith.constant 0 : index
    %c0_38 = arith.constant 0 : index
    %105 = vector.load %arg6[%c0_37, %c0_38] : memref<4x128xf32, #tpu.memory_space<vmem>>, vector<4x128xf32>
    %cst_39 = arith.constant dense<0.000000e+00> : vector<4x128xf32>
    %106 = tpu.matmul %105, %103, %cst_39 {dimension_numbers = #tpu.dot_dimension_numbers<[1], [0], [0], [1], [0, 0, 1, 1], [], []>} : vector<4x128xf32>, vector<128x128xf32>, vector<4x128xf32> -> vector<4x128xf32>
    %107 = vector.broadcast %104 : vector<1x128xf32> to vector<4x128xf32>
    %108 = arith.addf %106, %107 : vector<4x128xf32>
    %c0_40 = arith.constant 0 : index
    %c0_41 = arith.constant 0 : index
    %109 = vector.load %arg4[%c0_40, %c0_41] : memref<4x128xf32, #tpu.memory_space<vmem>>, vector<4x128xf32>
    tpu.vector_store %arg4[%c0_40, %c0_41], %108 {strides = array<i32>} : memref<4x128xf32, #tpu.memory_space<vmem>>, vector<4x128xf32>,
    return
  }
}

</mosaic_0001>

<bundles_post_ra>
// kernel: tpu_custom_call.1
= control target key start
LH: loop header
LB: loop body
LE: loop exit
PB: predicated region body
PF: predicated region fallthrough
CT: control target
= control target key end

     0   :  { %9 = vsyncpa [#allocation5], 0  ;;  %s2133_s0 = inlined_call_operand.hbm [shape: f32[4,3], index: 0, kind: input, shape index: {}]   ;;  %s2134_s1 = inlined_call_operand.hbm [shape: f32[3,384], index: 1, kind: input, shape index: {}]   ;;  %s2135_s2 = inlined_call_operand.hbm [shape: f32[128,384], index: 2, kind: input, shape index: {}]   ;;  %s2136_s3 = inlined_call_operand.hbm [shape: f32[130,128], index: 3, kind: input, shape index: {}]   ;;  %s2137_s4 = inlined_call_operand.hbm [shape: f32[4,128], index: 4, kind: output, shape index: {}]  }
   0x1   :  { %10 = vsyncpa [#allocation8], 0 }
   0x2   :  { %11 = vsyncpa [#allocation11], 0 }
   0x3   :  { %12 = vsyncpa [#allocation6], 0  ;;  %s1804_s15 = smov [#allocation7]   ;;  %s1805_s17 = smov [#allocation4]  }
   0x4   :  { %s29_s16 = sshll.u32 %s1804_s15, 4  ;;  %s19_s18 = sshll.u32 %s1805_s17, 4  ;;  %s30_s16 = int_to_ptr.vmem [resolvable:$true] %s29_s16  ;;  %s20_s18 = int_to_ptr.vmem [resolvable:$true] %s19_s18 }
   0x5   :  { %s1686_s21 = scalar_lea.hbm %s2134_s1, 192 }
   0x6   :  { %p1687_p0 = scmp.ne.s32.totalorder %s2134_s1, %s1686_s21  ;;  %p1690_p1 = scmp.lt.u32.totalorder %s1686_s21, %s2134_s1 }
   0x8   :  { %p1692_p2 = pnand %p1690_p1, %p1687_p0 }
   0xa   :  { %1695 = shalt.err (!%p1692_p2)
}
   0xb   :  { %s1696_s26 = scalar_lea.vmem %s30_s16, 192  ;;  %p1701_p4 = scmp.lt.s32.totalorder %s30_s16, %s30_s16 }
   0xc   :  { %p1697_p3 = scmp.ne.s32.totalorder %s30_s16, %s1696_s26  ;;  %p1702_p5 = scmp.lt.s32.totalorder %s1696_s26, %s1696_s26 }
   0xe   :  { %p1703_p6 = por %p1702_p5, %p1701_p4 }
  0x10   :  { %p1704_p7 = pnand %p1703_p6, %p1697_p3 }
  0x12   :  { %1707 = shalt.err (!%p1704_p7)
}
  0x13   :  { %32 = dma.hbm_to_vmem [thread:$0]  %s2134_s1, 192, %s30_s16, [#allocation8]  }
  0x14   :  { %s1708_s5 = scalar_lea.hbm %s2133_s0, 64 }
  0x15   :  { %p1709_p8 = scmp.ne.s32.totalorder %s2133_s0, %s1708_s5  ;;  %p1712_p9 = scmp.lt.u32.totalorder %s1708_s5, %s2133_s0 }
  0x17   :  { %p1714_p10 = pnand %p1712_p9, %p1709_p8 }
  0x19   :  { %1717 = shalt.err (!%p1714_p10)
}
  0x1a   :  { %s1718_s10 = scalar_lea.vmem %s20_s18, 64  ;;  %p1723_p12 = scmp.lt.s32.totalorder %s20_s18, %s20_s18 }
  0x1b   :  { %p1719_p11 = scmp.ne.s32.totalorder %s20_s18, %s1718_s10  ;;  %p1724_p13 = scmp.lt.s32.totalorder %s1718_s10, %s1718_s10 }
  0x1d   :  { %p1725_p0 = por %p1724_p13, %p1723_p12 }
  0x1f   :  { %p1726_p1 = pnand %p1725_p0, %p1719_p11 }
  0x21   :  { %1729 = shalt.err (!%p1726_p1)
}
  0x22   :  { %22 = dma.hbm_to_vmem [thread:$0]  %s2133_s0, 64, %s20_s18, [#allocation5]  }
  0x23   :  { %s1806_s12 = smov [#allocation9]   ;;  %s1730_s16 = scalar_lea.hbm %s2135_s2, 6144 }
  0x24   :  { %s38_s13 = sshll.u32 %s1806_s12, 4  ;;  %p1731_p2 = scmp.ne.s32.totalorder %s2135_s2, %s1730_s16  ;;  %s39_s13 = int_to_ptr.vmem [resolvable:$true] %s38_s13 }
  0x25   :  { %p1734_p3 = scmp.lt.u32.totalorder %s1730_s16, %s2135_s2 }
  0x27   :  { %p1736_p4 = pnand %p1734_p3, %p1731_p2 }
  0x29   :  { %1739 = shalt.err (!%p1736_p4)
}
  0x2a   :  { %s1740_s22 = scalar_lea.vmem %s39_s13, 6144  ;;  %p1745_p6 = scmp.lt.s32.totalorder %s39_s13, %s39_s13 }
  0x2b   :  { %p1741_p5 = scmp.ne.s32.totalorder %s39_s13, %s1740_s22  ;;  %p1746_p7 = scmp.lt.s32.totalorder %s1740_s22, %s1740_s22 }
  0x2d   :  { %p1747_p8 = por %p1746_p7, %p1745_p6 }
  0x2f   :  { %p1748_p9 = pnand %p1747_p8, %p1741_p5 }
  0x31   :  { %1751 = shalt.err (!%p1748_p9)
}
  0x32   :  { %s1807_s0 = smov 384   ;;  %s1808_s18 = smov 24  }
  0x33   :  { %44 = dma.hbm_to_vmem [thread:$0]  %s2135_s2, 6144, %s39_s13, [#allocation8], %s1807_s0, %s1807_s0, %s1808_s18  }
  0x34   :  { %s1809_s25 = smov [#allocation10]   ;;  %s1752_s29 = scalar_lea.hbm %s2136_s3, 2176 }
  0x35   :  { %s50_s26 = sshll.u32 %s1809_s25, 4  ;;  %p1753_p10 = scmp.ne.s32.totalorder %s2136_s3, %s1752_s29  ;;  %s51_s26 = int_to_ptr.vmem [resolvable:$true] %s50_s26 }
  0x36   :  { %p1756_p11 = scmp.lt.u32.totalorder %s1752_s29, %s2136_s3 }
  0x38   :  { %p1758_p12 = pnand %p1756_p11, %p1753_p10 }
  0x3a   :  { %1761 = shalt.err (!%p1758_p12)
}
  0x3b   :  { %s1762_s8 = scalar_lea.vmem %s51_s26, 2176  ;;  %p1767_p0 = scmp.lt.s32.totalorder %s51_s26, %s51_s26 }
  0x3c   :  { %p1763_p13 = scmp.ne.s32.totalorder %s51_s26, %s1762_s8  ;;  %p1768_p1 = scmp.lt.s32.totalorder %s1762_s8, %s1762_s8 }
  0x3e   :  { %p1769_p2 = por %p1768_p1, %p1767_p0 }
  0x40   :  { %p1770_p3 = pnand %p1769_p2, %p1763_p13 }
  0x42   :  { %1773 = shalt.err (!%p1770_p3)
}
  0x43   :  { %s1810_s2 = smov 128   ;;  %s1811_s9 = smov 8  }
  0x44   :  { %56 = dma.hbm_to_vmem [thread:$0]  %s2136_s3, 2176, %s51_s26, [#allocation11], %s1810_s2, %s1810_s2, %s1811_s9  }
  0x45   :  { %1796 = dma.done.wait [#allocation5], 64  }
  0x46   :  { %1797 = vsyncadd [#allocation5], 4294967232 }
  0x47   :  { %1798 = dma.done.wait [#allocation8], 6336  }
  0x48   :  { %1799 = vsyncadd [#allocation8], 4294960960 }
  0x49   :  { %1800 = dma.done.wait [#allocation11], 2176  }
  0x4a   :  { %1801 = vsyncadd [#allocation11], 4294965120  ;;  %v1812_v0 = vmov 0.0   ;;  %v234_v1 = vld [vmem:[#allocation9 + $0x8] sm:$0xff]  ;;  %v237_v2 = vld [vmem:[#allocation9 + $0x20] sm:$0xff]  ;;  %vm79_vm0 = vcmask 1042432  }
  0x4b   :  { %150 = vmatprep.mubr.f32.mxu1 %v1812_v0  ;;  %346 = vmatprep.mubr.f32.mxu0 %v1812_v0  ;;  %v233_v3 = vld [vmem:[#allocation9] sm:$0xff]  ;;  %v1892_v4 = vpack.c.bf16 %v237_v2, %v234_v1  ;;  %v236_v5 = vld [vmem:[#allocation9 + $0x18] sm:$0xff]  ;;  %v243_v7 = vld [vmem:[#allocation9 + $0x50] sm:$0xff]  ;;  %vm75_vm1 = vcmask 23552   ;;  %vm1813_vm2 = vmmov 0   ;;  %v1814_v42 = vmov 0.0|0.0  }
  0x4c   :  { %v240_v6 = vld [vmem:[#allocation9 + $0x38] sm:$0xff]  ;;  %v1894_v8 = vpack.c.bf16 %v236_v5, %v233_v3  ;;  %v239_v10 = vld [vmem:[#allocation9 + $0x30] sm:$0xff]  ;;  %v242_v11 = vld [vmem:[#allocation9 + $0x48] sm:$0xff]  ;;  %s1816_s3 = smov [#allocation12]  }
  0x4d   :  { %v1896_v9 = vpack.c.bf16 %v243_v7, %v240_v6  ;;  %v246_v12 = vld [vmem:[#allocation9 + $0x68] sm:$0xff]  ;;  %1401 = vmatprep.subr.bf16.mxu0 %v1892_v4  ;;  %v249_v13 = vld [vmem:[#allocation9 + $0x80] sm:$0xff]  ;;  %v1900_v14 = vpack.c.bf16 %v242_v11, %v239_v10  ;;  %v248_v17 = vld [vmem:[#allocation9 + $0x78] sm:$0xff]  ;;  %s1112_s11 = sshll.u32 %s1816_s3, 4  ;;  %s1113_s11 = int_to_ptr.vmem [resolvable:$true] %s1112_s11 }
  0x4e   :  { %1403 = vmatpush1.bf16.msra.mxu0 %v1894_v8  ;;  %v1903_v15 = vpack.c.bf16 %v249_v13, %v246_v12  ;;  %v245_v16 = vld [vmem:[#allocation9 + $0x60] sm:$0xff]  ;;  %v252_v18 = vld [vmem:[#allocation9 + $0x98] sm:$0xff]  ;;  %v255_v19 = vld [vmem:[#allocation9 + $0xb0] sm:$0xff]  ;;  %s1774_s12 = scalar_lea.vmem %s1113_s11, 64  ;;  %p1779_p5 = scmp.lt.s32.totalorder %s1113_s11, %s1113_s11 }
  0x4f   :  { %1405 = vmatprep.subr.bf16.mxu0 %v1896_v9  ;;  %v1906_v20 = vpack.c.bf16 %v248_v17, %v245_v16  ;;  %v70_v21 = vld [vmem:[#allocation7] sm:$0x77]  ;;  %v1909_v22 = vpack.c.bf16 %v255_v19, %v252_v18  ;;  %v254_v24 = vld [vmem:[#allocation9 + $0xa8] sm:$0xff]  ;;  %v261_v27 = vld [vmem:[#allocation9 + $0xe0] sm:$0xff]  ;;  %p1775_p4 = scmp.ne.s32.totalorder %s1113_s11, %s1774_s12  ;;  %p1780_p6 = scmp.lt.s32.totalorder %s1774_s12, %s1774_s12 }
  0x50   :  { %v251_v23 = vld [vmem:[#allocation9 + $0x90] sm:$0xff]  ;;  %v74_v25 = vcombine.high %v70_v21, %v70_v21  ;;  %v258_v26 = vld [vmem:[#allocation9 + $0xc8] sm:$0xff]  ;;  %v71_v31 = vld [vmem:[#allocation7 + $0x8] sm:$0x7] }
  0x51   :  { %v69_v28 = vld [vmem:[#allocation4] sm:$0xf]  ;;  %v1913_v30 = vpack.c.bf16 %v254_v24, %v251_v23  ;;  %v238_v32 = vld [vmem:[#allocation9 + $0x28] sm:$0xff]  ;;  %v1917_v33 = vpack.c.bf16 %v261_v27, %v258_v26  ;;  %v257_v34 = vld [vmem:[#allocation9 + $0xc0] sm:$0xff]  ;;  %v1815_v27 = vmov 1966171168   ;;  %p1781_p7 = por %p1780_p6, %p1779_p5 }
  0x52   :  { %1407 = vmatpush1.bf16.msra.mxu0 %v1900_v14  ;;  %1123 = vmatprep.subr.msk.mxu1 %vm79_vm0, %v74_v25  ;;  %v235_v29 = vld [vmem:[#allocation9 + $0x10] sm:$0xff]  ;;  %v260_v35 = vld [vmem:[#allocation9 + $0xd8] sm:$0xff]  ;;  %v241_v39 = vld [vmem:[#allocation9 + $0x40] sm:$0xff] }
  0x53   :  { %1409 = vmatprep.subr.bf16.mxu0 %v1903_v15  ;;  %1124 = vmatpush1.msk.msra.mxu1 %vm79_vm0, %v70_v21  ;;  %v264_v36 = vld [vmem:[#allocation9 + $0xf8] sm:$0xff]  ;;  %v267_v37 = vld [vmem:[#allocation9 + $0x110] sm:$0xff]  ;;  %v1923_v38 = vpack.c.bf16 %v238_v32, %v235_v29  ;;  %v1927_v41 = vpack.c.bf16 %v260_v35, %v257_v34  ;;  %v266_v45 = vld [vmem:[#allocation9 + $0x108] sm:$0xff]  ;;  %v430_v29 = vlaneseq  ;;  %p1782_p8 = pnand %p1781_p7, %p1775_p4 }
  0x54   :  { %1125 = vmatmul.mubr.msk.f32.vlgmr.msra.gmra.mrb[0].mxu1 %vm75_vm1, %v69_v28  ;;  %1220 = vmatprep.subr.mxu1 %v1812_v0  ;;  %v244_v40 = vld [vmem:[#allocation9 + $0x58] sm:$0xff]  ;;  %v1931_v43 = vpack.c.bf16 %v267_v37, %v264_v36  ;;  %v263_v44 = vld [vmem:[#allocation9 + $0xf0] sm:$0xff]  ;;  %v270_v46 = vld [vmem:[#allocation9 + $0x128] sm:$0xff] }
  0x55   :  { %1222 = vmatprep.mubr.msk.f32.mxu1 %vm1813_vm2, %v1812_v0  ;;  %1221 = vmatpush3.msk.msra.mxu1 %vm79_vm0, %v71_v31  ;;  %v273_v47 = vld [vmem:[#allocation9 + $0x140] sm:$0xff]  ;;  %v1935_v48 = vpack.c.bf16 %v244_v40, %v241_v39  ;;  %v247_v49 = vld [vmem:[#allocation9 + $0x70] sm:$0xff]  ;;  %v250_v50 = vld [vmem:[#allocation9 + $0x88] sm:$0xff]  ;;  %v1941_v51 = vpack.c.bf16 %v266_v45, %v263_v44  ;;  %v431_v32 = vshrl.u32 %v430_v29, 7 }
  0x56   :  { %1411 = vmatpush1.bf16.msra.mxu0 %v1906_v20  ;;  %1432 = vmatprep.subr.bf16.mxu1 %v1814_v42  ;;  %v1944_v52 = vpack.c.bf16 %v273_v47, %v270_v46  ;;  %v269_v53 = vld [vmem:[#allocation9 + $0x120] sm:$0xff]  ;;  %v272_v54 = vld [vmem:[#allocation9 + $0x138] sm:$0xff]  ;;  %v279_v56 = vld [vmem:[#allocation9 + $0x170] sm:$0xff]  ;;  %v1947_v57 = vpack.c.bf16 %v250_v50, %v247_v49 }
  0x57   :  { %1413 = vmatprep.subr.bf16.mxu0 %v1909_v22  ;;  %v276_v55 = vld [vmem:[#allocation9 + $0x158] sm:$0xff]  ;;  %v253_v58 = vld [vmem:[#allocation9 + $0xa0] sm:$0xff]  ;;  %v1951_v60 = vpack.c.bf16 %v272_v54, %v269_v53  ;;  %v275_v62 = vld [vmem:[#allocation9 + $0x150] sm:$0xff] }
  0x58   :  { %1223 = vmatmul.mubr.msk.f32.vlgmr.msra.gmra.mrb[2].mxu1 %vm75_vm1, %v69_v28  ;;  %v256_v59 = vld [vmem:[#allocation9 + $0xb8] sm:$0xff]  ;;  %v1954_v61 = vpack.c.bf16 %v279_v56, %v276_v55  ;;  %v278_v63 = vld [vmem:[#allocation9 + $0x168] sm:$0xff]  ;;  %v259_v2 = vld [vmem:[#allocation9 + $0xd0] sm:$0xff]  ;;  %v428_v28 = vunpack.c.l.s4 %v1815_v27 }
  0x59   :  { %1434 = vmatpush3.bf16.msra.mxu1 %v1923_v38  ;;  %1257 = vmatprep.mubr.msk.f32.mxu1 %vm1813_vm2, %v1812_v0  ;;  %v1957_v1 = vpack.c.bf16 %v256_v59, %v253_v58  ;;  %v262_v3 = vld [vmem:[#allocation9 + $0xe8] sm:$0xff]  ;;  %v1961_v5 = vpack.c.bf16 %v278_v63, %v275_v62  ;;  %v265_v7 = vld [vmem:[#allocation9 + $0x100] sm:$0xff]  ;;  %v268_v10 = vld [vmem:[#allocation9 + $0x118] sm:$0xff] }
  0x5a   :  { %1415 = vmatpush1.bf16.msra.mxu0 %v1913_v30  ;;  %1435 = vmatprep.subr.bf16.mxu1 %v1814_v42  ;;  %v1965_v6 = vpack.c.bf16 %v262_v3, %v259_v2  ;;  %v1971_v11 = vpack.c.bf16 %v268_v10, %v265_v7  ;;  %v271_v12 = vld [vmem:[#allocation9 + $0x130] sm:$0xff]  ;;  %v274_v13 = vld [vmem:[#allocation9 + $0x148] sm:$0xff]  ;;  %v277_v17 = vld [vmem:[#allocation9 + $0x160] sm:$0xff]  ;;  %v429_v31 = vunpack.c.0.s8 %v428_v28 }
  0x5b   :  { %1417 = vmatprep.subr.bf16.mxu0 %v1917_v33  ;;  %v1979_v16 = vpack.c.bf16 %v274_v13, %v271_v12  ;;  %v280_v18 = vld [vmem:[#allocation9 + $0x178] sm:$0xff]  ;;  %v2025_v54 = vld [vmem:[#allocation10 + $0x80] sm:$0x1] }
  0x5c   :  { %v1985_v19 = vpack.c.bf16 %v280_v18, %v277_v17  ;;  %v2021_v35 = vsub.s32 %v429_v31, %v431_v32 }
  0x5d   :  { %1437 = vmatpush3.bf16.msra.mxu1 %v1935_v48 }
  0x5e   :  { %1419 = vmatpush1.bf16.msra.mxu0 %v1927_v41  ;;  %1438 = vmatprep.subr.bf16.mxu1 %v1814_v42 }
  0x5f   :  { %1421 = vmatprep.subr.bf16.mxu0 %v1931_v43 }
  0x61   :  { %1440 = vmatpush3.bf16.msra.mxu1 %v1947_v57 }
  0x62   :  { %1423 = vmatpush1.bf16.msra.mxu0 %v1941_v51  ;;  %1441 = vmatprep.subr.bf16.mxu1 %v1814_v42 }
  0x63   :  { %1425 = vmatprep.subr.bf16.mxu0 %v1944_v52 }
  0x65   :  { %1443 = vmatpush3.bf16.msra.mxu1 %v1957_v1 }
  0x66   :  { %1427 = vmatpush1.bf16.msra.mxu0 %v1951_v60  ;;  %1444 = vmatprep.subr.bf16.mxu1 %v1814_v42 }
  0x67   :  { %1429 = vmatprep.subr.bf16.mxu0 %v1954_v61 }
  0x69   :  { %1446 = vmatpush3.bf16.msra.mxu1 %v1965_v6 }
  0x6a   :  { %1431 = vmatpush1.bf16.msra.mxu0 %v1961_v5  ;;  %1447 = vmatprep.subr.bf16.mxu1 %v1814_v42 }
  0x6b   :  { %1457 = vmatprep.subr.bf16.mxu0 %v1892_v4 }
  0x6d   :  { %347 = vmatmul.mubr.f32.vlgmr.msra.gmra.mrb[0].mxu0 %v1812_v0  ;;  %1449 = vmatpush3.bf16.msra.mxu1 %v1971_v11 }
  0x6e   :  { %1459 = vmatpush1.bf16.msra.mxu0 %v1894_v8  ;;  %528 = vmatprep.mubr.f32.mxu0 %v1812_v0 }
  0x6f   :  { %1461 = vmatprep.subr.bf16.mxu0 %v1896_v9  ;;  %1450 = vmatprep.subr.bf16.mxu1 %v1814_v42 }
  0x71   :  { %1452 = vmatpush3.bf16.msra.mxu1 %v1979_v16 }
  0x72   :  { %1463 = vmatpush1.bf16.msra.mxu0 %v1900_v14  ;;  %1453 = vmatprep.subr.bf16.mxu1 %v1814_v42 }
  0x73   :  { %1465 = vmatprep.subr.bf16.mxu0 %v1903_v15 }
  0x75   :  { %1455 = vmatpush3.bf16.msra.mxu1 %v1985_v19 }
  0x76   :  { %1467 = vmatpush1.bf16.msra.mxu0 %v1906_v20  ;;  %1488 = vmatprep.subr.bf16.mxu1 %v1814_v42 }
  0x77   :  { %1469 = vmatprep.subr.bf16.mxu0 %v1909_v22 }
  0x78   :  { %1258 = vmatmul.mubr.f32.vlgmr.msra.gmra.mrb[4].mxu1 %v1812_v0 }
  0x79   :  { %1490 = vmatpush3.bf16.msra.mxu1 %v1923_v38  ;;  %1292 = vmatprep.mubr.msk.f32.mxu1 %vm1813_vm2, %v1812_v0 }
  0x7a   :  { %1471 = vmatpush1.bf16.msra.mxu0 %v1913_v30  ;;  %1491 = vmatprep.subr.bf16.mxu1 %v1814_v42 }
  0x7b   :  { %1473 = vmatprep.subr.bf16.mxu0 %v1917_v33 }
  0x7d   :  { %1493 = vmatpush3.bf16.msra.mxu1 %v1935_v48 }
  0x7e   :  { %1475 = vmatpush1.bf16.msra.mxu0 %v1927_v41  ;;  %1494 = vmatprep.subr.bf16.mxu1 %v1814_v42 }
  0x7f   :  { %1477 = vmatprep.subr.bf16.mxu0 %v1931_v43 }
  0x81   :  { %1496 = vmatpush3.bf16.msra.mxu1 %v1947_v57 }
  0x82   :  { %1479 = vmatpush1.bf16.msra.mxu0 %v1941_v51  ;;  %1497 = vmatprep.subr.bf16.mxu1 %v1814_v42 }
  0x83   :  { %1481 = vmatprep.subr.bf16.mxu0 %v1944_v52 }
  0x85   :  { %1499 = vmatpush3.bf16.msra.mxu1 %v1957_v1 }
  0x86   :  { %1483 = vmatpush1.bf16.msra.mxu0 %v1951_v60  ;;  %1500 = vmatprep.subr.bf16.mxu1 %v1814_v42 }
  0x87   :  { %1485 = vmatprep.subr.bf16.mxu0 %v1954_v61 }
  0x89   :  { %1502 = vmatpush3.bf16.msra.mxu1 %v1965_v6 }
  0x8a   :  { %1487 = vmatpush1.bf16.msra.mxu0 %v1961_v5  ;;  %1503 = vmatprep.subr.bf16.mxu1 %v1814_v42 }
  0x8b   :  { %1513 = vmatprep.subr.bf16.mxu0 %v1892_v4 }
  0x8d   :  { %1505 = vmatpush3.bf16.msra.mxu1 %v1971_v11 }
  0x8e   :  { %1506 = vmatprep.subr.bf16.mxu1 %v1814_v42 }
  0x91   :  { %1508 = vmatpush3.bf16.msra.mxu1 %v1979_v16 }
  0x92   :  { %1509 = vmatprep.subr.bf16.mxu1 %v1814_v42 }
  0x95   :  { %1511 = vmatpush3.bf16.msra.mxu1 %v1985_v19 }
  0x96   :  { %1544 = vmatprep.subr.bf16.mxu1 %v1814_v42 }
 0x127   :  { %v152_v21 = vpop.f32.mrb[0].mxu1 }
 0x128   :  { %v154_v23 = vpop.f32.mrb[1].mxu1 }
 0x129   :  { %v229_v24 = vcombine.low %v152_v21, %v154_v23 }
 0x12b   :  { %231 = vst [vmem:[#allocation2] sm:$0xff] %v229_v24  ;;  %v223_v25 = vpop.f32.mrb[2].mxu1 }
 0x12c   :  { %232 = vst [vmem:[#allocation2 + $0x8] sm:$0xf] %v223_v25  ;;  %v1224_v26 = vpop.f32.mrb[3].mxu1 }
 0x133   :  { %v423_v44 = vld [vmem:[#allocation2] ss:$4 sm:$0x7]  ;;  %v606_v26 = vld [vmem:[#allocation2 + $0x1] ss:$4 sm:$0x7] }
 0x134   :  { %v452_v59 = vrot.slane %v423_v44, 2 }
 0x140   :  { %v348_v34 = vpop.f32.mrb[0].mxu0 }
 0x141   :  { %v350_v36 = vpop.f32.mrb[1].mxu0 }
 0x142   :  { %v426_v37 = vcombine.low %v348_v34, %v350_v36  ;;  %v635_v36 = vrot.slane %v606_v26, 2 }
 0x144   :  { %v433_v39 = vrot.slane %v426_v37, %v2021_v35 }
 0x146   :  { %v440_v40 = vrot.slane %v433_v39, %v2021_v35 }
 0x148   :  { %v442_v45 = vadd.f32 %v440_v40, %v423_v44 }
 0x14a   :  { %v1128_v46 = vmul.f32 -1.442695, %v442_v45 }
 0x14b   :  { %v419_v47 = vpop.f32.mrb[4].mxu1 }
 0x14c   :  { %1662 = vpow2.f32 %v1128_v46  ;;  %v1259_v49 = vpop.f32.mrb[5].mxu1  ;;  %v449_v55 = vadd.f32 %v419_v47, %v2025_v54 }
 0x14d   :  { %v1013_v49 = vld [vmem:[#allocation10] sm:$0xff] }
 0x156   :  { %v1663_v50 = vpop.eup %1662 }
 0x157   :  { %v446_v53 = vadd.f32 1.0, %v1663_v50  ;;  %v1014_v50 = vld [vmem:[#allocation10 + $0x8] sm:$0xff] }
 0x159   :  { %1664 = vrcp.f32 %v446_v53  ;;  %v1625_v53 = vpack.c.bf16 %v1014_v50, %v1013_v49 }
 0x163   :  { %v1665_v56 = vpop.eup %1664 }
 0x164   :  { %v450_v58 = vmul.f32 %v1665_v56, %v449_v55  ;;  %v457_v63 = vrot.slane %v1665_v56, 1  ;;  %v1015_v55 = vld [vmem:[#allocation10 + $0x10] sm:$0xff]  ;;  %v1016_v56 = vld [vmem:[#allocation10 + $0x18] sm:$0xff] }
 0x166   :  { %v454_v62 = vadd.f32 %v452_v59, %v450_v58  ;;  %v459_v2 = vsub.f32 1.0, %v457_v63  ;;  %v461_v10 = vmul.f32 0.0, %v457_v63  ;;  %v1628_v58 = vpack.c.bf16 %v1016_v56, %v1015_v55  ;;  %v1017_v59 = vld [vmem:[#allocation10 + $0x20] sm:$0xff] }
 0x168   :  { %1666 = vtanh.f32 %v454_v62  ;;  %v1018_v62 = vld [vmem:[#allocation10 + $0x28] sm:$0xff] }
 0x169   :  { %v1631_v63 = vpack.c.bf16 %v1018_v62, %v1017_v59 }
 0x172   :  { %v1667_v3 = vpop.eup %1666 }
 0x173   :  { %v460_v7 = vmul.f32 %v1667_v3, %v459_v2  ;;  %v1019_v2 = vld [vmem:[#allocation10 + $0x30] sm:$0xff] }
 0x175   :  { %v462_v12 = vadd.f32 %v461_v10, %v460_v7  ;;  %v1021_v7 = vld [vmem:[#allocation10 + $0x40] sm:$0xff]  ;;  %v1022_v10 = vld [vmem:[#allocation10 + $0x48] sm:$0xff] }
 0x177   :  { %463 = vst [vmem:[#allocation3] sm:$0x1] %v462_v12  ;;  %529 = vmatmul.mubr.f32.vlgmr.msra.gmra.mrb[2].mxu0 %v462_v12  ;;  %1293 = vmatmul.mubr.f32.vlgmr.msra.gmra.mrb[6].mxu1 %v462_v12 }
 0x178   :  { %1515 = vmatpush1.bf16.msra.mxu0 %v1894_v8  ;;  %1546 = vmatpush3.bf16.msra.mxu1 %v1923_v38 }
 0x179   :  { %1517 = vmatprep.subr.bf16.mxu0 %v1896_v9  ;;  %1547 = vmatprep.subr.bf16.mxu1 %v1814_v42 }
 0x17a   :  { %711 = vmatprep.mubr.f32.mxu0 %v1812_v0  ;;  %1327 = vmatprep.mubr.msk.f32.mxu1 %vm1813_vm2, %v1812_v0 }
 0x17c   :  { %1519 = vmatpush1.bf16.msra.mxu0 %v1900_v14  ;;  %1549 = vmatpush3.bf16.msra.mxu1 %v1935_v48 }
 0x17d   :  { %1521 = vmatprep.subr.bf16.mxu0 %v1903_v15  ;;  %1550 = vmatprep.subr.bf16.mxu1 %v1814_v42 }
 0x180   :  { %1523 = vmatpush1.bf16.msra.mxu0 %v1906_v20  ;;  %1552 = vmatpush3.bf16.msra.mxu1 %v1947_v57 }
 0x181   :  { %1525 = vmatprep.subr.bf16.mxu0 %v1909_v22  ;;  %1553 = vmatprep.subr.bf16.mxu1 %v1814_v42 }
 0x184   :  { %1527 = vmatpush1.bf16.msra.mxu0 %v1913_v30  ;;  %1555 = vmatpush3.bf16.msra.mxu1 %v1957_v1 }
 0x185   :  { %1529 = vmatprep.subr.bf16.mxu0 %v1917_v33  ;;  %1556 = vmatprep.subr.bf16.mxu1 %v1814_v42 }
 0x188   :  { %1531 = vmatpush1.bf16.msra.mxu0 %v1927_v41  ;;  %1558 = vmatpush3.bf16.msra.mxu1 %v1965_v6 }
 0x189   :  { %1533 = vmatprep.subr.bf16.mxu0 %v1931_v43  ;;  %1559 = vmatprep.subr.bf16.mxu1 %v1814_v42 }
 0x18c   :  { %1535 = vmatpush1.bf16.msra.mxu0 %v1941_v51  ;;  %1561 = vmatpush3.bf16.msra.mxu1 %v1971_v11 }
 0x18d   :  { %1537 = vmatprep.subr.bf16.mxu0 %v1944_v52  ;;  %1562 = vmatprep.subr.bf16.mxu1 %v1814_v42 }
 0x190   :  { %1539 = vmatpush1.bf16.msra.mxu0 %v1951_v60  ;;  %1564 = vmatpush3.bf16.msra.mxu1 %v1979_v16 }
 0x191   :  { %1541 = vmatprep.subr.bf16.mxu0 %v1954_v61  ;;  %1565 = vmatprep.subr.bf16.mxu1 %v1814_v42 }
 0x194   :  { %1543 = vmatpush1.bf16.msra.mxu0 %v1961_v5  ;;  %1567 = vmatpush3.bf16.msra.mxu1 %v1985_v19 }
 0x195   :  { %1569 = vmatprep.subr.bf16.mxu0 %v1892_v4  ;;  %1600 = vmatprep.subr.bf16.mxu1 %v1814_v42 }
 0x24a   :  { %v530_v13 = vpop.f32.mrb[2].mxu0  ;;  %v601_v17 = vpop.f32.mrb[6].mxu1 }
 0x24b   :  { %v532_v18 = vpop.f32.mrb[3].mxu0  ;;  %v1294_v21 = vpop.f32.mrb[7].mxu1  ;;  %v632_v4 = vadd.f32 %v601_v17, %v2025_v54  ;;  %v1024_v17 = vld [vmem:[#allocation10 + $0x58] sm:$0xff] }
 0x24c   :  { %v609_v23 = vcombine.low %v530_v13, %v532_v18  ;;  %v1023_v13 = vld [vmem:[#allocation10 + $0x50] sm:$0xff]  ;;  %v1025_v21 = vld [vmem:[#allocation10 + $0x60] sm:$0xff] }
 0x24d   :  { %v1640_v18 = vpack.c.bf16 %v1024_v17, %v1023_v13 }
 0x24e   :  { %v616_v24 = vrot.slane %v609_v23, %v2021_v35  ;;  %v1026_v23 = vld [vmem:[#allocation10 + $0x68] sm:$0xff] }
 0x250   :  { %v623_v25 = vrot.slane %v616_v24, %v2021_v35  ;;  %v1643_v24 = vpack.c.bf16 %v1026_v23, %v1025_v21 }
 0x252   :  { %v625_v27 = vadd.f32 %v623_v25, %v606_v26  ;;  %v1027_v25 = vld [vmem:[#allocation10 + $0x70] sm:$0xff]  ;;  %v1028_v26 = vld [vmem:[#allocation10 + $0x78] sm:$0xff] }
 0x254   :  { %v1129_v28 = vmul.f32 -1.442695, %v625_v27  ;;  %v1646_v27 = vpack.c.bf16 %v1028_v26, %v1027_v25 }
 0x256   :  { %1668 = vpow2.f32 %v1129_v28 }
 0x260   :  { %v1669_v29 = vpop.eup %1668 }
 0x261   :  { %v629_v31 = vadd.f32 1.0, %v1669_v29 }
 0x263   :  { %1670 = vrcp.f32 %v629_v31 }
 0x26d   :  { %v1671_v32 = vpop.eup %1670 }
 0x26e   :  { %v633_v34 = vmul.f32 %v1671_v32, %v632_v4  ;;  %v640_v39 = vrot.slane %v1671_v32, 1 }
 0x270   :  { %v637_v37 = vadd.f32 %v635_v36, %v633_v34  ;;  %v642_v40 = vsub.f32 1.0, %v640_v39  ;;  %v644_v46 = vmul.f32 %v640_v39, %v462_v12  ;;  %v1637_v12 = vpack.c.bf16 %v1022_v10, %v1021_v7 }
 0x272   :  { %1672 = vtanh.f32 %v637_v37  ;;  %v972_v37 = vld [vmem:[#allocation2 + $0x3] ss:$4 sm:$0x7] }
 0x27c   :  { %v1673_v44 = vpop.eup %1672 }
 0x27d   :  { %v643_v45 = vmul.f32 %v1673_v44, %v642_v40 }
 0x27f   :  { %v645_v47 = vadd.f32 %v644_v46, %v643_v45 }
 0x281   :  { %646 = vst [vmem:[#allocation3 + $0x1] sm:$0x1] %v645_v47  ;;  %712 = vmatmul.mubr.f32.vlgmr.msra.gmra.mrb[4].mxu0 %v645_v47  ;;  %1328 = vmatmul.mubr.f32.vlgmr.msra.gmra.mrb[8].mxu1 %v645_v47 }
 0x282   :  { %1571 = vmatpush1.bf16.msra.mxu0 %v1894_v8  ;;  %1602 = vmatpush3.bf16.msra.mxu1 %v1923_v38 }
 0x283   :  { %1573 = vmatprep.subr.bf16.mxu0 %v1896_v9  ;;  %1603 = vmatprep.subr.bf16.mxu1 %v1814_v42 }
 0x284   :  { %894 = vmatprep.mubr.f32.mxu0 %v1812_v0  ;;  %1362 = vmatprep.mubr.msk.f32.mxu1 %vm1813_vm2, %v1812_v0 }
 0x286   :  { %1575 = vmatpush1.bf16.msra.mxu0 %v1900_v14  ;;  %1605 = vmatpush3.bf16.msra.mxu1 %v1935_v48 }
 0x287   :  { %1577 = vmatprep.subr.bf16.mxu0 %v1903_v15  ;;  %1606 = vmatprep.subr.bf16.mxu1 %v1814_v42 }
 0x28a   :  { %1579 = vmatpush1.bf16.msra.mxu0 %v1906_v20  ;;  %1608 = vmatpush3.bf16.msra.mxu1 %v1947_v57 }
 0x28b   :  { %1581 = vmatprep.subr.bf16.mxu0 %v1909_v22  ;;  %1609 = vmatprep.subr.bf16.mxu1 %v1814_v42 }
 0x28e   :  { %1583 = vmatpush1.bf16.msra.mxu0 %v1913_v30  ;;  %1611 = vmatpush3.bf16.msra.mxu1 %v1957_v1 }
 0x28f   :  { %1585 = vmatprep.subr.bf16.mxu0 %v1917_v33  ;;  %1612 = vmatprep.subr.bf16.mxu1 %v1814_v42  ;;  %v789_v33 = vld [vmem:[#allocation2 + $0x2] ss:$4 sm:$0x7] }
 0x292   :  { %1587 = vmatpush1.bf16.msra.mxu0 %v1927_v41  ;;  %1614 = vmatpush3.bf16.msra.mxu1 %v1965_v6 }
 0x293   :  { %1589 = vmatprep.subr.bf16.mxu0 %v1931_v43  ;;  %1615 = vmatprep.subr.bf16.mxu1 %v1814_v42 }
 0x296   :  { %1591 = vmatpush1.bf16.msra.mxu0 %v1941_v51  ;;  %1617 = vmatpush3.bf16.msra.mxu1 %v1971_v11 }
 0x297   :  { %1593 = vmatprep.subr.bf16.mxu0 %v1944_v52  ;;  %1618 = vmatprep.subr.bf16.mxu1 %v1814_v42 }
 0x29a   :  { %1595 = vmatpush1.bf16.msra.mxu0 %v1951_v60  ;;  %1620 = vmatpush3.bf16.msra.mxu1 %v1979_v16  ;;  %v818_v60 = vrot.slane %v789_v33, 2 }
 0x29b   :  { %1597 = vmatprep.subr.bf16.mxu0 %v1954_v61  ;;  %1621 = vmatprep.subr.bf16.mxu1 %v1814_v42 }
 0x29e   :  { %1599 = vmatpush1.bf16.msra.mxu0 %v1961_v5  ;;  %1623 = vmatpush3.bf16.msra.mxu1 %v1985_v19 }
 0x29f   :  { %1624 = vmatprep.subr.bf16.mxu0 %v1814_v42 }
 0x354   :  { %v713_v8 = vpop.f32.mrb[4].mxu0  ;;  %v784_v9 = vpop.f32.mrb[8].mxu1 }
 0x355   :  { %v715_v14 = vpop.f32.mrb[5].mxu0  ;;  %v1329_v15 = vpop.f32.mrb[9].mxu1  ;;  %v815_v51 = vadd.f32 %v784_v9, %v2025_v54 }
 0x356   :  { %v792_v20 = vcombine.low %v713_v8, %v715_v14  ;;  %v1001_v8 = vrot.slane %v972_v37, 2 }
 0x358   :  { %v799_v22 = vrot.slane %v792_v20, %v2021_v35 }
 0x35a   :  { %v806_v30 = vrot.slane %v799_v22, %v2021_v35 }
 0x35c   :  { %v808_v38 = vadd.f32 %v806_v30, %v789_v33 }
 0x35e   :  { %v1130_v41 = vmul.f32 -1.442695, %v808_v38  ;;  %v1132_v38 = vld [vmem:[#allocation10 + $0x81] ss:$0 sm:$0xff] }
 0x360   :  { %1674 = vpow2.f32 %v1130_v41 }
 0x36a   :  { %v1675_v43 = vpop.eup %1674 }
 0x36b   :  { %v812_v48 = vadd.f32 1.0, %v1675_v43 }
 0x36d   :  { %1676 = vrcp.f32 %v812_v48 }
 0x377   :  { %v1677_v52 = vpop.eup %1676 }
 0x378   :  { %v816_v57 = vmul.f32 %v1677_v52, %v815_v51  ;;  %v823_v1 = vrot.slane %v1677_v52, 1 }
 0x37a   :  { %v820_v61 = vadd.f32 %v818_v60, %v816_v57  ;;  %v825_v5 = vsub.f32 1.0, %v823_v1  ;;  %v827_v16 = vmul.f32 %v823_v1, %v645_v47 }
 0x37c   :  { %1678 = vtanh.f32 %v820_v61 }
 0x386   :  { %v1679_v6 = vpop.eup %1678 }
 0x387   :  { %v826_v11 = vmul.f32 %v1679_v6, %v825_v5 }
 0x389   :  { %v2103_v19 = vadd.f32 %v827_v16, %v826_v11 }
 0x38b   :  { %829 = vst [vmem:[#allocation3 + $0x2] sm:$0x1] %v2103_v19  ;;  %895 = vmatmul.mubr.f32.vlgmr.msra.gmra.mrb[6].mxu0 %v2103_v19  ;;  %1363 = vmatmul.mubr.f32.vlgmr.msra.gmra.mrb[10].mxu1 %v2103_v19 }
 0x38c   :  { %1397 = vmatprep.mubr.msk.f32.mxu0 %vm1813_vm2, %v1812_v0  ;;  %1626 = vmatpush3.bf16.msra.mxu0 %v1625_v53  ;;  %v1020_v0 = vld [vmem:[#allocation10 + $0x38] sm:$0xff] }
 0x38d   :  { %1627 = vmatprep.subr.bf16.mxu0 %v1814_v42  ;;  %v1634_v3 = vpack.c.bf16 %v1020_v0, %v1019_v2 }
 0x390   :  { %1629 = vmatpush3.bf16.msra.mxu0 %v1628_v58 }
 0x391   :  { %1630 = vmatprep.subr.bf16.mxu0 %v1814_v42 }
 0x394   :  { %1632 = vmatpush3.bf16.msra.mxu0 %v1631_v63 }
 0x395   :  { %1633 = vmatprep.subr.bf16.mxu0 %v1814_v42 }
 0x398   :  { %1635 = vmatpush3.bf16.msra.mxu0 %v1634_v3 }
 0x399   :  { %1636 = vmatprep.subr.bf16.mxu0 %v1814_v42 }
 0x39c   :  { %1638 = vmatpush3.bf16.msra.mxu0 %v1637_v12 }
 0x39d   :  { %1639 = vmatprep.subr.bf16.mxu0 %v1814_v42 }
 0x3a0   :  { %1641 = vmatpush3.bf16.msra.mxu0 %v1640_v18 }
 0x3a1   :  { %1642 = vmatprep.subr.bf16.mxu0 %v1814_v42 }
 0x3a4   :  { %1644 = vmatpush3.bf16.msra.mxu0 %v1643_v24 }
 0x3a5   :  { %1645 = vmatprep.subr.bf16.mxu0 %v1814_v42 }
 0x3a8   :  { %1647 = vmatpush3.bf16.msra.mxu0 %v1646_v27 }
 0x45e   :  { %v896_v28 = vpop.f32.mrb[6].mxu0  ;;  %v967_v29 = vpop.f32.mrb[10].mxu1 }
 0x45f   :  { %v898_v31 = vpop.f32.mrb[7].mxu0  ;;  %v1364_v4 = vpop.f32.mrb[11].mxu1  ;;  %v998_v46 = vadd.f32 %v967_v29, %v2025_v54 }
 0x460   :  { %v975_v32 = vcombine.low %v896_v28, %v898_v31 }
 0x462   :  { %v982_v34 = vrot.slane %v975_v32, %v2021_v35 }
 0x464   :  { %v989_v36 = vrot.slane %v982_v34, %v2021_v35 }
 0x466   :  { %v991_v39 = vadd.f32 %v989_v36, %v972_v37 }
 0x468   :  { %v1131_v40 = vmul.f32 -1.442695, %v991_v39 }
 0x46a   :  { %1680 = vpow2.f32 %v1131_v40 }
 0x474   :  { %v1681_v44 = vpop.eup %1680 }
 0x475   :  { %v995_v45 = vadd.f32 1.0, %v1681_v44 }
 0x477   :  { %1682 = vrcp.f32 %v995_v45 }
 0x481   :  { %v1683_v42 = vpop.eup %1682 }
 0x482   :  { %v999_v47 = vmul.f32 %v1683_v42, %v998_v46  ;;  %v1006_v14 = vrot.slane %v1683_v42, 1 }
 0x484   :  { %v1003_v9 = vadd.f32 %v1001_v8, %v999_v47  ;;  %v1008_v15 = vsub.f32 1.0, %v1006_v14  ;;  %v1010_v35 = vmul.f32 %v1006_v14, %v2103_v19 }
 0x486   :  { %1684 = vtanh.f32 %v1003_v9 }
 0x490   :  { %v1685_v20 = vpop.eup %1684 }
 0x491   :  { %v1009_v22 = vmul.f32 %v1685_v20, %v1008_v15 }
 0x493   :  { %v1011_v30 = vadd.f32 %v1010_v35, %v1009_v22 }
 0x495   :  { %1012 = vst [vmem:[#allocation3 + $0x3] sm:$0x1] %v1011_v30 }
 0x49c   :  { %v1030_v33 = vld [vmem:[#allocation3] sm:$0xf] }
 0x49d   :  { %1398 = vmatmul.mubr.f32.vlgmr.msra.gmra.mrb[8].mxu0 %v1030_v33 }
 0x570   :  { %v1101_v41 = vpop.f32.mrb[8].mxu0 }
 0x571   :  { %v1102_v54 = vadd.f32 %v1132_v38, %v1101_v41  ;;  %v1399_v43 = vpop.f32.mrb[9].mxu0 }
 0x573   :  { %1105 = vst [vmem:[#allocation12] sm:$0xf] %v1102_v54 }
 0x574   :  { %1785 = shalt.err (!%p1782_p8)
}
 0x575   :  { %s1786_s15 = scalar_lea.hbm %s2137_s4, 64 }
 0x576   :  { %p1787_p9 = scmp.ne.s32.totalorder %s2137_s4, %s1786_s15  ;;  %p1790_p10 = scmp.lt.u32.totalorder %s1786_s15, %s2137_s4 }
 0x578   :  { %p1792_p11 = pnand %p1790_p10, %p1787_p9 }
 0x57a   :  { %1795 = shalt.err (!%p1792_p11)
}
 0x57b   :  { %1115 = dma.vmem_to_hbm [thread:$0]  %s1113_s11, 64, %s2137_s4, [#allocation6]  }
 0x57c   :  { %1802 = dma.done.wait [#allocation6], 64  }
 0x57d   :  { %1803 = vsyncadd [#allocation6], 4294967232 }
 0x57e   :  { %1119 = vsyncpa [#allocation5], 1 }
 0x57f   :  { %1120 = vsyncpa [#allocation8], 1 }
 0x580   :  { %1121 = vsyncpa [#allocation11], 1 }
 0x581   :  { %1122 = vsyncpa [#allocation6], 1 }

</bundles_post_ra>
